<compile_context>
chip_gen: v7x
topology: tpu7x:2x2x1
jax: 0.10.0
libtpu: 0.0.40
codegen_flags: <defaults>
</compile_context>

<pallas_src>
import jax
import jax.numpy as jnp
from jax.experimental import pallas as pl
from jax.experimental.pallas import tpu as pltpu


_TARGET_BLOCK_BYTES = 4 << 20       # ~4 MiB of input per grid step
_DEFAULT_SCOPED_VMEM = 16 << 20     # most conservative default (v5e)
_VMEM_HEADROOM = 16 << 20           # leave >=16 MiB of physical VMEM free


def _pick_tb(num_planes, plane_bytes, need_mult8):
    """Planes per block. Returns (tb, padded_num_planes) or (None, None)."""
    total = num_planes * plane_bytes
    if total <= _TARGET_BLOCK_BYTES:
        return num_planes, num_planes                  # single block, no tail
    step = 8 if need_mult8 else 1                      # sublane rule for 2D blocks
    budget = max(1, _TARGET_BLOCK_BYTES // plane_bytes)
    cap = (budget // step) * step
    if cap < step:
        return None, None                              # planes too big for this path
    lo = max(step, cap // 2)
    for d in range(cap, lo - 1, -step):                # prefer a divisor: no pad copy
        if num_planes % d == 0:
            return d, num_planes
    # No good divisor: pad the plane axis with zero planes (they contribute 0).
    return cap, ((num_planes + cap - 1) // cap) * cap


def tv_loss(x, tv_loss_weight: float = 1.0):
    """x: (B, C, H, W) array (NCHW). Returns scalar float32 TV loss."""
    B, C, H, W = x.shape
    # H == 1 or W == 1 gives a zero count -> inf/nan, matching PyTorch.
    count_h = float(C * (H - 1) * W)
    count_w = float(C * H * (W - 1))
    inv_ch = (1.0 / count_h) if count_h > 0 else float("nan")
    inv_cw = (1.0 / count_w) if count_w > 0 else float("nan")

    P = B * C                     # number of (H, W) planes
    L = H * W                     # flattened plane length (lane-dense layout)
    itemsize = jnp.dtype(x.dtype).itemsize
    plane_bytes = L * itemsize

    # Lane-dense roll path whenever the flattened plane is 128-lane aligned.
    flat_ok = (L % 128 == 0)
    if flat_ok:
        tb, P_pad = _pick_tb(P, plane_bytes, need_mult8=True)
        if tb is None:
            flat_ok = False
    if not flat_ok:
        tb, P_pad = _pick_tb(P, plane_bytes, need_mult8=False)
        # TODO(synk): for planes too large for a double-buffered whole-plane
        # block (v7x: 64 MiB VMEM), block along H with a 1-row halo instead.

    num_blocks = P_pad // tb
    block_bytes = tb * plane_bytes

    # VMEM: double-buffered input blocks + f32 intermediates + slack.
    f32_block = tb * L * 4
    vmem_need = 2 * block_bytes + 4 * f32_block + (2 << 20)
    vmem_limit_bytes = None
    if vmem_need > _DEFAULT_SCOPED_VMEM:
        try:
            cap = pltpu.get_tpu_info().vmem_capacity_bytes
        except Exception:
            cap = 64 << 20                             # assume the smallest (v7x)
        vmem_limit_bytes = min(vmem_need, max(cap - _VMEM_HEADROOM, cap // 2))

    n_elems = P * L
    cost = pl.CostEstimate(
        flops=6 * n_elems,                             # subs + squares + mask-mul + adds
        transcendentals=0,
        bytes_accessed=n_elems * itemsize + 2 * L * 4 + num_blocks * 4,
    )

    if flat_ok:
        x_in = x.reshape(P, L)
        if P_pad > P:
            x_in = jnp.pad(x_in, ((0, P_pad - P), (0, 0)))   # zero planes add 0
        pos = jnp.arange(L, dtype=jnp.int32)
        mask_h = (pos < (H - 1) * W).astype(jnp.float32).reshape(1, L)
        mask_w = ((pos % W) != (W - 1)).astype(jnp.float32).reshape(1, L)

        def kernel(x_ref, mh_ref, mw_ref, o_ref):
            xb = x_ref[...].astype(jnp.float32)              # (tb, L), lane-dense
            # "next row" / "next column" via XLU rolls; the wrap-around seams are
            # killed by the resident 0/1 masks (one VPU mul, no iota/select).
            dh = pltpu.roll(xb, shift=L - W, axis=1) - xb
            dw = pltpu.roll(xb, shift=L - 1, axis=1) - xb
            h_part = jnp.sum(dh * dh * mh_ref[...])
            w_part = jnp.sum(dw * dw * mw_ref[...])
            o_ref[...] = jnp.reshape(h_part * inv_ch + w_part * inv_cw, (1, 1, 1))

        in_specs = [
            pl.BlockSpec((tb, L), lambda i: (i, 0)),
            pl.BlockSpec((1, L), lambda i: (0, 0)),          # resident seam masks
            pl.BlockSpec((1, L), lambda i: (0, 0)),
        ]
        args = (x_in, mask_h, mask_w)
    else:
        # Fallback for planes whose flattened length is not 128-aligned (or too
        # large for the flat path): proven slice-based whole-plane blocks.
        x_in = x.reshape(P, H, W)
        if P_pad > P:
            x_in = jnp.pad(x_in, ((0, P_pad - P), (0, 0), (0, 0)))

        def kernel(x_ref, o_ref):
            xb = x_ref[...].astype(jnp.float32)              # (tb, H, W)
            if H > 1:
                dh = xb[:, 1:, :] - xb[:, :-1, :]
                h_part = jnp.sum(dh * dh)
            else:
                h_part = jnp.float32(0.0)
            if W > 1:
                dw = xb[:, :, 1:] - xb[:, :, :-1]
                w_part = jnp.sum(dw * dw)
            else:
                w_part = jnp.float32(0.0)
            o_ref[...] = jnp.reshape(h_part * inv_ch + w_part * inv_cw, (1, 1, 1))

        in_specs = [pl.BlockSpec((tb, H, W), lambda i: (i, 0, 0))]
        args = (x_in,)

    parts = pl.pallas_call(
        kernel,
        out_shape=jax.ShapeDtypeStruct((num_blocks, 1, 1), jnp.float32),
        grid=(num_blocks,),
        in_specs=in_specs,
        out_specs=pl.BlockSpec((1, 1, 1), lambda i: (i, 0, 0)),
        compiler_params=pltpu.CompilerParams(
            # Independent per-block partials: parallel -> megacore split on v7x.
            dimension_semantics=("parallel",),
            vmem_limit_bytes=vmem_limit_bytes,
        ),
        cost_estimate=cost,
    )(*args)

    # Final tree reduction + scaling in the wrapper (partials are pre-divided).
    return (tv_loss_weight * 2.0) * jnp.sum(parts) / B


def tv_loss_ref(x, tv_loss_weight: float = 1.0):
    """Pure-JAX reference matching the PyTorch module."""
    B, C, H, W = x.shape
    count_h = C * (H - 1) * W
    count_w = C * H * (W - 1)
    x = x.astype(jnp.float32)
    h_tv = jnp.sum((x[:, :, 1:, :] - x[:, :, :-1, :]) ** 2)
    w_tv = jnp.sum((x[:, :, :, 1:] - x[:, :, :, :-1]) ** 2)
    return tv_loss_weight * 2.0 * (h_tv / count_h + w_tv / count_w) / B


if __name__ == "__main__":
    key = jax.random.PRNGKey(0)
    B, C, H, W = 2, 4, 16, 16
    x = jax.random.normal(key, (B, C, H, W), dtype=jnp.float32)

    loss = tv_loss(x, tv_loss_weight=1.0)
    loss = jax.block_until_ready(loss)

    ref = tv_loss_ref(x, tv_loss_weight=1.0)
    assert jnp.allclose(loss, ref, rtol=1e-5, atol=1e-5), (loss, ref)

    print("KERNEL_OK")
</pallas_src>

<mosaic_0001>
module attributes {stable_mosaic.version = 11 : i64} {
  func.func @kernel(%arg0: i32, %arg1: memref<8x256xf32, #tpu.memory_space<vmem>>, %arg2: memref<1x256xf32, #tpu.memory_space<vmem>>, %arg3: memref<1x256xf32, #tpu.memory_space<vmem>>, %arg4: memref<1x1x1xf32, #tpu.memory_space<vmem>>) attributes {dimension_semantics = [#tpu.dimension_semantics<parallel>], iteration_bounds = array<i64: 1>, scalar_prefetch = 0 : i64, scratch_operands = 0 : i64, tpu.core_type = #tpu.core_type<tc>, window_params = [{transform_indices = @transform_0, window_bounds = array<i64: 8, 256>}, {pipeline_mode = #tpu.pipeline_mode<synchronous>, transform_indices = @transform_1, window_bounds = array<i64: 1, 256>}, {pipeline_mode = #tpu.pipeline_mode<synchronous>, transform_indices = @transform_2, window_bounds = array<i64: 1, 256>}, {transform_indices = @transform_3, window_bounds = array<i64: 1, 1, 1>}]} {
    %c0 = arith.constant 0 : index
    %c0_0 = arith.constant 0 : index
    %0 = vector.load %arg1[%c0, %c0_0] : memref<8x256xf32, #tpu.memory_space<vmem>>, vector<8x256xf32>
    %c240_i32 = arith.constant 240 : i32
    %1 = tpu.dynamic_rotate %0 by %c240_i32 dim 1 : vector<8x256xf32>, i32 -> vector<8x256xf32>
    %2 = arith.subf %1, %0 : vector<8x256xf32>
    %c255_i32 = arith.constant 255 : i32
    %3 = tpu.dynamic_rotate %0 by %c255_i32 dim 1 : vector<8x256xf32>, i32 -> vector<8x256xf32>
    %4 = arith.subf %3, %0 : vector<8x256xf32>
    %5 = arith.mulf %2, %2 : vector<8x256xf32>
    %c0_1 = arith.constant 0 : index
    %c0_2 = arith.constant 0 : index
    %6 = vector.load %arg2[%c0_1, %c0_2] : memref<1x256xf32, #tpu.memory_space<vmem>>, vector<1x256xf32>
    %7 = vector.broadcast %6 : vector<1x256xf32> to vector<8x256xf32>
    %8 = arith.mulf %5, %7 : vector<8x256xf32>
    %9 = vector.shape_cast %8 : vector<8x256xf32> to vector<1x8x256xf32>
    %cst = arith.constant dense<0.000000e+00> : vector<1xf32>
    %10 = vector.multi_reduction <add>, %9, %cst [1, 2] : vector<1x8x256xf32> to vector<1xf32>
    %11 = vector.shape_cast %10 : vector<1xf32> to vector<1x1x1xf32>
    %12 = vector.extract %11[0, 0, 0] : f32 from vector<1x1x1xf32>
    %13 = arith.mulf %4, %4 : vector<8x256xf32>
    %c0_3 = arith.constant 0 : index
    %c0_4 = arith.constant 0 : index
    %14 = vector.load %arg3[%c0_3, %c0_4] : memref<1x256xf32, #tpu.memory_space<vmem>>, vector<1x256xf32>
    %15 = vector.broadcast %14 : vector<1x256xf32> to vector<8x256xf32>
    %16 = arith.mulf %13, %15 : vector<8x256xf32>
    %17 = vector.shape_cast %16 : vector<8x256xf32> to vector<1x8x256xf32>
    %cst_5 = arith.constant dense<0.000000e+00> : vector<1xf32>
    %18 = vector.multi_reduction <add>, %17, %cst_5 [1, 2] : vector<1x8x256xf32> to vector<1xf32>
    %19 = vector.shape_cast %18 : vector<1xf32> to vector<1x1x1xf32>
    %20 = vector.extract %19[0, 0, 0] : f32 from vector<1x1x1xf32>
    %cst_6 = arith.constant 0.00104166672 : f32
    %21 = arith.mulf %12, %cst_6 : f32
    %cst_7 = arith.constant 0.00104166672 : f32
    %22 = arith.mulf %20, %cst_7 : f32
    %23 = arith.addf %21, %22 : f32
    %24 = vector.broadcast %23 : f32 to vector<1x1x1xf32>
    %c0_8 = arith.constant 0 : index
    %c0_9 = arith.constant 0 : index
    %c0_10 = arith.constant 0 : index
    %25 = vector.load %arg4[%c0_8, %c0_9, %c0_10] : memref<1x1x1xf32, #tpu.memory_space<vmem>>, vector<1x1x1xf32>
    tpu.vector_store %arg4[%c0_8, %c0_9, %c0_10], %24 {strides = array<i32>} : memref<1x1x1xf32, #tpu.memory_space<vmem>>, vector<1x1x1xf32>,
    return
  }
  func.func @transform_0(%arg0: i32) -> (i32, i32) {
    %c0_i32 = arith.constant 0 : i32
    %c0_i32_0 = arith.constant 0 : i32
    return %arg0, %c0_i32 : i32, i32
  }
  func.func @transform_1(%arg0: i32) -> (i32, i32) {
    %c0_i32 = arith.constant 0 : i32
    %c0_i32_0 = arith.constant 0 : i32
    %c0_i32_1 = arith.constant 0 : i32
    return %c0_i32, %c0_i32_0 : i32, i32
  }
  func.func @transform_2(%arg0: i32) -> (i32, i32) {
    %c0_i32 = arith.constant 0 : i32
    %c0_i32_0 = arith.constant 0 : i32
    %c0_i32_1 = arith.constant 0 : i32
    return %c0_i32, %c0_i32_0 : i32, i32
  }
  func.func @transform_3(%arg0: i32) -> (i32, i32, i32) {
    %c0_i32 = arith.constant 0 : i32
    %c0_i32_0 = arith.constant 0 : i32
    %c0_i32_1 = arith.constant 0 : i32
    return %arg0, %c0_i32, %c0_i32_0 : i32, i32, i32
  }
}

</mosaic_0001>

<bundles_post_ra>
// kernel: tpu_custom_call.1
= control target key start
LH: loop header
LB: loop body
LE: loop exit
PB: predicated region body
PF: predicated region fallthrough
CT: control target
= control target key end

     0   :  { %8 = vsyncpa [#allocation3], 0  ;;  %s232_s0 = inlined_call_operand.hbm [shape: f32[8,256], index: 0, kind: input, shape index: {}]   ;;  %s233_s1 = inlined_call_operand.vmem [shape: f32[1,256], index: 1, kind: input, shape index: {}]   ;;  %s234_s2 = inlined_call_operand.vmem [shape: f32[1,256], index: 2, kind: input, shape index: {}]   ;;  %s235_s3 = inlined_call_operand.hbm [shape: f32[1,1,1], index: 3, kind: output, shape index: {}]  }
   0x1   :  { %9 = vsyncpa [#allocation4], 0  ;;  %s178_s12 = smov [#allocation2]   ;;  %s130_s16 = scalar_lea.hbm %s232_s0, 256 }
   0x2   :  { %s16_s13 = sshll.u32 %s178_s12, 4  ;;  %p131_p0 = scmp.ne.s32.totalorder %s232_s0, %s130_s16  ;;  %s17_s13 = int_to_ptr.vmem [resolvable:$true] %s16_s13 }
   0x3   :  { %p134_p1 = scmp.lt.u32.totalorder %s130_s16, %s232_s0 }
   0x5   :  { %p136_p2 = pnand %p134_p1, %p131_p0 }
   0x7   :  { %139 = shalt.err (!%p136_p2)
}
   0x8   :  { %s140_s21 = scalar_lea.vmem %s17_s13, 256  ;;  %p145_p4 = scmp.lt.s32.totalorder %s17_s13, %s17_s13 }
   0x9   :  { %p141_p3 = scmp.ne.s32.totalorder %s17_s13, %s140_s21  ;;  %p146_p5 = scmp.lt.s32.totalorder %s140_s21, %s140_s21 }
   0xb   :  { %p147_p6 = por %p146_p5, %p145_p4 }
   0xd   :  { %p148_p7 = pnand %p147_p6, %p141_p3 }
   0xf   :  { %151 = shalt.err (!%p148_p7)
}
  0x10   :  { %19 = dma.hbm_to_vmem [thread:$0]  %s232_s0, 256, %s17_s13, [#allocation3]  }
  0x11   :  { %174 = dma.done.wait [#allocation3], 256  }
  0x12   :  { %175 = vsyncadd [#allocation3], 4294967040  ;;  %v27_v0 = vld [vmem:[#allocation2] sm:$0xff]  ;;  %s179_s24 = smov 127   ;;  %s180_s25 = smov 112   ;;  %v28_v1 = vld [vmem:[#allocation2 + $0x8] sm:$0xff]  ;;  %v33_v2 = vlaneseq }
  0x13   :  { %40 = vrot.lane.b32.xlu1 %v27_v0, %s179_s24  ;;  %29 = vrot.lane.b32.xlu0 %v27_v0, %s180_s25  ;;  %v77_v9 = vld [vmem:[%s234_s2] sm:$0x3]  ;;  %s181_s4 = smov [#allocation5]   ;;  %vm105_vm2 = vcmask 0  }
  0x14   :  { %v54_v3 = vshrl.u32 %v33_v2, 7  ;;  %v34_v4 = vand.u32 127, %v33_v2  ;;  %v51_v10 = vld [vmem:[%s233_s1] sm:$0x3]  ;;  %s113_s5 = sshll.u32 %s181_s4, 4  ;;  %s114_s5 = int_to_ptr.vmem [resolvable:$true] %s113_s5 }
  0x15   :  { %s152_s7 = scalar_lea.vmem %s114_s5, 16  ;;  %s156_s8 = scalar_lea.vmem %s114_s5, 32 }
  0x16   :  { %v55_v7 = vsub.s32 0, %v54_v3  ;;  %v59_v8 = vsub.s32 1, %v54_v3  ;;  %vm44_vm0 = vcmp.lt.s32.totalorder %v34_v4, 127  ;;  %vm35_vm1 = vcmp.lt.s32.totalorder %v34_v4, 112  ;;  %p153_p8 = scmp.ne.s32.totalorder %s114_s5, %s152_s7  ;;  %p157_p9 = scmp.lt.s32.totalorder %s114_s5, %s114_s5 }
  0x17   :  { %42 = vrot.lane.b32.xlu1 %v28_v1, %s179_s24  ;;  %31 = vrot.lane.b32.xlu0 %v28_v1, %s180_s25  ;;  %p158_p10 = scmp.lt.s32.totalorder %s156_s8, %s152_s7 }
  0x18   :  { %v82_v13 = vrot.slane %v77_v9, %v55_v7  ;;  %v86_v14 = vrot.slane %v77_v9, %v59_v8  ;;  %v56_v15 = vrot.slane %v51_v10, %v55_v7  ;;  %v60_v16 = vrot.slane %v51_v10, %v59_v8 }
  0x19   :  { %p159_p11 = por %p158_p10, %p157_p9 }
  0x1b   :  { %p160_p12 = pnand %p159_p11, %p153_p8 }
  0x85   :  { %v41_v5 = vpop.permute.xlu1 %40  ;;  %v30_v6 = vpop.permute.xlu0 %29 }
  0x89   :  { %v43_v11 = vpop.permute.xlu1 %42  ;;  %v32_v12 = vpop.permute.xlu0 %31 }
  0x8a   :  { %v45_v17 = vsel %vm44_vm0, %v41_v5, %v43_v11  ;;  %v46_v18 = vsel %vm44_vm0, %v43_v11, %v41_v5  ;;  %v36_v19 = vsel %vm35_vm1, %v30_v6, %v32_v12  ;;  %v37_v20 = vsel %vm35_vm1, %v32_v12, %v30_v6 }
  0x8b   :  { %v47_v21 = vsub.f32 %v45_v17, %v27_v0  ;;  %v48_v22 = vsub.f32 %v46_v18, %v28_v1  ;;  %v38_v23 = vsub.f32 %v36_v19, %v27_v0  ;;  %v39_v24 = vsub.f32 %v37_v20, %v28_v1 }
  0x8d   :  { %v75_v25 = vmul.f32 %v47_v21, %v47_v21  ;;  %v76_v26 = vmul.f32 %v48_v22, %v48_v22  ;;  %v49_v27 = vmul.f32 %v38_v23, %v38_v23  ;;  %v50_v28 = vmul.f32 %v39_v24, %v39_v24 }
  0x8f   :  { %v89_v29 = vmul.f32 %v82_v13, %v75_v25  ;;  %v90_v30 = vmul.f32 %v86_v14, %v76_v26  ;;  %v63_v31 = vmul.f32 %v56_v15, %v49_v27  ;;  %v64_v32 = vmul.f32 %v60_v16, %v50_v28 }
  0x91   :  { %v91_v33 = vadd.f32 %v90_v30, %v89_v29  ;;  %v65_v34 = vadd.f32 %v64_v32, %v63_v31 }
  0x93   :  { %92 = vadd.xlane.f32.xlu1 %v91_v33  ;;  %66 = vadd.xlane.f32.xlu0 %v65_v34 }
 0x120   :  { %v93_v35 = vpop.xlane.xlu1 %92  ;;  %v67_v36 = vpop.xlane.xlu0 %66 }
 0x121   :  { %v94_v37 = vrot.slane %v93_v35, 4  ;;  %v68_v38 = vrot.slane %v67_v36, 4 }
 0x123   :  { %v95_v39 = vadd.f32 %v94_v37, %v93_v35  ;;  %v69_v40 = vadd.f32 %v68_v38, %v67_v36 }
 0x125   :  { %v96_v41 = vrot.slane %v95_v39, 2  ;;  %v70_v42 = vrot.slane %v69_v40, 2 }
 0x127   :  { %v97_v43 = vadd.f32 %v96_v41, %v95_v39  ;;  %v71_v44 = vadd.f32 %v70_v42, %v69_v40 }
 0x129   :  { %v72_v45 = vrot.slane %v71_v44, 1  ;;  %v98_v46 = vrot.slane %v97_v43, 1 }
 0x12b   :  { %v73_v47 = vadd.f32 %v72_v45, %v71_v44  ;;  %v99_v48 = vadd.f32 %v98_v46, %v97_v43 }
 0x12d   :  { %122 = vpush %v73_v47 }
 0x12e   :  { %124 = vpush %v99_v48 }
 0x15e   :  { %s123_s1 = spop %122 }
 0x15f   :  { %s101_s2 = smul.f32 0.0010416667, %s123_s1  ;;  %s125_s29 = spop %124 }
 0x160   :  { %s102_s30 = smul.f32 0.0010416667, %s125_s29 }
 0x162   :  { %s103_s6 = sadd.f32 %s102_s30, %s101_s2 }
 0x164   :  { %v104_v49 = vstv %s103_s6 }
 0x165   :  { %106 = vst.msk [vmem:[#allocation5] sm:$0x1] %vm105_vm2, %v104_v49 }
 0x166   :  { %163 = shalt.err (!%p160_p12)
}
 0x167   :  { %s164_s11 = scalar_lea.hbm %s235_s3, 16 }
 0x168   :  { %p165_p13 = scmp.ne.s32.totalorder %s235_s3, %s164_s11  ;;  %p168_p0 = scmp.lt.u32.totalorder %s164_s11, %s235_s3 }
 0x16a   :  { %p170_p1 = pnand %p168_p0, %p165_p13 }
 0x16c   :  { %173 = shalt.err (!%p170_p1)
}
 0x16d   :  { %116 = dma.vmem_to_hbm [thread:$0]  %s114_s5, 16, %s235_s3, [#allocation4]  }
 0x16e   :  { %176 = dma.done.wait [#allocation4], 16  }
 0x16f   :  { %177 = vsyncadd [#allocation4], 4294967280 }
 0x170   :  { %120 = vsyncpa [#allocation3], 1 }
 0x171   :  { %121 = vsyncpa [#allocation4], 1 }

</bundles_post_ra>
